<compile_context>
chip_gen: v6e
topology: v6e:2x2x1
jax: 0.10.0
libtpu: 0.0.40
codegen_flags: <defaults>
</compile_context>

<pallas_src>
import functools

import jax
import jax.numpy as jnp
from jax.experimental import pallas as pl
from jax.experimental.pallas import tpu as pltpu


def _backbone_kernel(roi_size, feat_dim,
                     feat_ref,                      # [T, roi_size*D]
                     wf1_ref, wfs_ref, wf3_ref, bf_ref,   # [D,D],[D,D],[D,D],[1,D]
                     wh1_ref, bh1_ref,              # [D, 3E], [1, 3E]
                     wh2_ref, bh2_ref,              # [3E, C1+2], [1, C1+2]
                     out_ref):                      # [T, C1+2]
    D = feat_dim
    r1 = roi_size // 6
    r5 = r1 * 5

    feat = feat_ref[...]

    def seg_max(lo, hi):
        # max over roi positions [lo, hi); each slice is a contiguous lane block.
        acc = feat[:, lo * D:(lo + 1) * D]
        for i in range(lo + 1, hi):
            acc = jnp.maximum(acc, feat[:, i * D:(i + 1) * D])
        return acc

    f1 = seg_max(0, r1)
    f2 = seg_max(r1, r5)
    f3 = seg_max(r5, roi_size)

    # prop_fusion: relu([f2-f1, f2, f2-f3] @ Wf + bf)
    #            = relu(f2 @ (W1+W2+W3) - f1 @ W1 - f3 @ W3 + bf)
    fuse = jnp.dot(f2, wfs_ref[...], preferred_element_type=jnp.float32)
    fuse = fuse - jnp.dot(f1, wf1_ref[...], preferred_element_type=jnp.float32)
    fuse = fuse - jnp.dot(f3, wf3_ref[...], preferred_element_type=jnp.float32)
    fuse = jnp.maximum(fuse + bf_ref[...], 0.0)

    # fused heads: one wide [T, D] @ [D, 3E] matmul + ReLU, then one
    # block-diagonal [T, 3E] @ [3E, C1+2] matmul -> single output writeback.
    h = jnp.maximum(
        jnp.dot(fuse, wh1_ref[...], preferred_element_type=jnp.float32)
        + bh1_ref[...], 0.0)
    out_ref[...] = (jnp.dot(h, wh2_ref[...], preferred_element_type=jnp.float32)
                    + bh2_ref[...])


def backbone_proposal_forward(feat, params, roi_size, row_tile=None):
    """feat: [B, M, roi_size, D] float32
       -> (prop_cas [B, C+1, M], prop_attn [B, 1, M], prop_iou [B, 1, M])"""
    assert roi_size >= 6, "roi_size must be >= 6 (roi_size//6 segment split)"
    B, M, R, D = feat.shape
    assert R == roi_size
    E = D // 2
    C1 = params["wc2"].shape[1]          # n_class + 1
    out_w = C1 + 2                       # cas | attn | iou packed along lanes

    rows = B * M
    if row_tile is None:
        row_tile = 128 if rows >= 128 else max(8, ((rows + 7) // 8) * 8)
    rows_padded = ((rows + row_tile - 1) // row_tile) * row_tile

    # flatten roi into lanes: [rows, R*D]
    feat_flat = feat.reshape(rows, R * D)
    if rows_padded != rows:
        feat_flat = jnp.pad(feat_flat, ((0, rows_padded - rows), (0, 0)))

    # --- pack weights (tiny, one-time per call; fuses under jit) ---
    wf = params["wf"]                    # [3D, D]
    wf1, wf2, wf3 = wf[:D], wf[D:2 * D], wf[2 * D:]
    wfs = wf1 + wf2 + wf3                # Wsum variant: drops 2 VPU subs in-kernel

    wh1 = jnp.concatenate([params["wc1"], params["wa1"], params["wi1"]], axis=1)  # [D, 3E]
    bh1 = jnp.concatenate([params["bc1"], params["ba1"], params["bi1"]], axis=1)  # [1, 3E]

    wh2 = jnp.zeros((3 * E, out_w), dtype=jnp.float32)
    wh2 = wh2.at[:E, :C1].set(params["wc2"])
    wh2 = wh2.at[E:2 * E, C1:C1 + 1].set(params["wa2"])
    wh2 = wh2.at[2 * E:, C1 + 1:].set(params["wi2"])
    bh2 = jnp.concatenate([params["bc2"], params["ba2"], params["bi2"]], axis=1)  # [1, C1+2]

    kernel = functools.partial(_backbone_kernel, roi_size, D)

    def wspec(shape):
        return pl.BlockSpec(shape, lambda i: (0, 0))

    in_specs = [
        pl.BlockSpec((row_tile, R * D), lambda i: (i, 0)),   # feat row tile
        wspec((D, D)), wspec((D, D)), wspec((D, D)), wspec((1, D)),
        wspec((D, 3 * E)), wspec((1, 3 * E)),
        wspec((3 * E, out_w)), wspec((1, out_w)),
    ]
    out_spec = pl.BlockSpec((row_tile, out_w), lambda i: (i, 0))

    # rough VMEM budget: double-buffered feat/out tiles + resident weights +
    # headroom for intermediates; clamp to safe scoped limits (v7x has 64 MiB).
    vmem_bytes = 4 * (2 * row_tile * R * D
                      + 2 * row_tile * out_w
                      + 3 * D * D + D + D * 3 * E + 3 * E + 3 * E * out_w + out_w
                      + row_tile * (4 * D + 3 * E + out_w))
    vmem_limit = int(min(96 << 20, max(32 << 20, vmem_bytes * 2)))

    out = pl.pallas_call(
        kernel,
        out_shape=jax.ShapeDtypeStruct((rows_padded, out_w), jnp.float32),
        grid=(rows_padded // row_tile,),
        in_specs=in_specs,
        out_specs=out_spec,
        compiler_params=pltpu.CompilerParams(
            dimension_semantics=("parallel",),
            vmem_limit_bytes=vmem_limit),
    )(feat_flat, wf1, wfs, wf3, params["bf"], wh1, bh1, wh2, bh2)

    out = out[:rows]
    cas = out[:, :C1].reshape(B, M, C1)
    attn = out[:, C1:C1 + 1].reshape(B, M, 1)
    iou = out[:, C1 + 1:].reshape(B, M, 1)

    # match PyTorch output layout: [B, C, M] / [B, 1, M]
    return (jnp.transpose(cas, (0, 2, 1)),
            jnp.transpose(attn, (0, 2, 1)),
            jnp.transpose(iou, (0, 2, 1)))


def _reference_forward(feat, params, roi_size):
    """Pure-JAX reference mirroring the PyTorch forward (eval mode)."""
    r1 = roi_size // 6
    r5 = r1 * 5
    f1 = jnp.max(feat[:, :, :r1, :], axis=2)
    f2 = jnp.max(feat[:, :, r1:r5, :], axis=2)
    f3 = jnp.max(feat[:, :, r5:, :], axis=2)
    x = jnp.concatenate([f2 - f1, f2, f2 - f3], axis=-1)
    fuse = jnp.maximum(x @ params["wf"] + params["bf"], 0.0)

    def head(w1, b1, w2, b2):
        h = jnp.maximum(fuse @ w1 + b1, 0.0)
        return h @ w2 + b2

    cas = head(params["wc1"], params["bc1"], params["wc2"], params["bc2"])
    attn = head(params["wa1"], params["ba1"], params["wa2"], params["ba2"])
    iou = head(params["wi1"], params["bi1"], params["wi2"], params["bi2"])
    return (jnp.transpose(cas, (0, 2, 1)),
            jnp.transpose(attn, (0, 2, 1)),
            jnp.transpose(iou, (0, 2, 1)))


def _init_params(key, feat_dim, n_class):
    embed_dim = feat_dim // 2
    c1 = n_class + 1
    ks = jax.random.split(key, 8)

    def w(k, shape):
        return (0.02 * jax.random.normal(k, shape)).astype(jnp.float32)

    return {
        # prop_fusion: Linear(3D -> D); stored as [in, out], bias as [1, out]
        "wf": w(ks[0], (3 * feat_dim, feat_dim)),
        "bf": w(ks[1], (1, feat_dim)),
        # prop_classifier: Conv1d(D,E,1) + Conv1d(E, C+1, 1)
        "wc1": w(ks[2], (feat_dim, embed_dim)), "bc1": w(ks[3], (1, embed_dim)),
        "wc2": w(ks[4], (embed_dim, c1)),       "bc2": w(ks[5], (1, c1)),
        # prop_attention: Conv1d(D,E,1) + Conv1d(E,1,1)
        "wa1": w(ks[6], (feat_dim, embed_dim)), "ba1": w(ks[7], (1, embed_dim)),
        "wa2": w(jax.random.fold_in(key, 100), (embed_dim, 1)),
        "ba2": w(jax.random.fold_in(key, 101), (1, 1)),
        # prop_completeness: Conv1d(D,E,1) + Conv1d(E,1,1)
        "wi1": w(jax.random.fold_in(key, 102), (feat_dim, embed_dim)),
        "bi1": w(jax.random.fold_in(key, 103), (1, embed_dim)),
        "wi2": w(jax.random.fold_in(key, 104), (embed_dim, 1)),
        "bi2": w(jax.random.fold_in(key, 105), (1, 1)),
    }


if __name__ == "__main__":
    # Small shapes consistent with the module: feat [B, M, roi_size, D]
    B, M, roi_size, feat_dim, n_class = 2, 8, 12, 32, 4

    key = jax.random.PRNGKey(0)
    k_feat, k_par = jax.random.split(key)
    feat = jax.random.normal(k_feat, (B, M, roi_size, feat_dim), dtype=jnp.float32)
    params = _init_params(k_par, feat_dim, n_class)

    # NOTE: nn.Dropout is identity in eval mode; implemented as identity here.
    cas, attn, iou = backbone_proposal_forward(feat, params, roi_size)
    jax.block_until_ready((cas, attn, iou))

    # sanity check against a pure-JAX reference of the same forward
    cas_r, attn_r, iou_r = _reference_forward(feat, params, roi_size)
    assert cas.shape == (B, n_class + 1, M)
    assert attn.shape == (B, 1, M) and iou.shape == (B, 1, M)
    assert jnp.allclose(cas, cas_r, rtol=1e-4, atol=1e-4)
    assert jnp.allclose(attn, attn_r, rtol=1e-4, atol=1e-4)
    assert jnp.allclose(iou, iou_r, rtol=1e-4, atol=1e-4)

    print("KERNEL_OK")
</pallas_src>

<mosaic_0001>
module attributes {stable_mosaic.version = 11 : i64} {
  func.func @_backbone_kernel(%arg0: i32, %arg1: memref<16x384xf32, #tpu.memory_space<vmem>>, %arg2: memref<32x32xf32, #tpu.memory_space<vmem>>, %arg3: memref<32x32xf32, #tpu.memory_space<vmem>>, %arg4: memref<32x32xf32, #tpu.memory_space<vmem>>, %arg5: memref<1x32xf32, #tpu.memory_space<vmem>>, %arg6: memref<32x48xf32, #tpu.memory_space<vmem>>, %arg7: memref<1x48xf32, #tpu.memory_space<vmem>>, %arg8: memref<48x7xf32, #tpu.memory_space<vmem>>, %arg9: memref<1x7xf32, #tpu.memory_space<vmem>>, %arg10: memref<16x7xf32, #tpu.memory_space<vmem>>) attributes {dimension_semantics = [#tpu.dimension_semantics<parallel>], iteration_bounds = array<i64: 1>, scalar_prefetch = 0 : i64, scratch_operands = 0 : i64, tpu.core_type = #tpu.core_type<tc>, window_params = [{transform_indices = @transform_0, window_bounds = array<i64: 16, 384>}, {pipeline_mode = #tpu.pipeline_mode<synchronous>, transform_indices = @transform_1, window_bounds = array<i64: 32, 32>}, {pipeline_mode = #tpu.pipeline_mode<synchronous>, transform_indices = @transform_2, window_bounds = array<i64: 32, 32>}, {pipeline_mode = #tpu.pipeline_mode<synchronous>, transform_indices = @transform_3, window_bounds = array<i64: 32, 32>}, {pipeline_mode = #tpu.pipeline_mode<synchronous>, transform_indices = @transform_4, window_bounds = array<i64: 1, 32>}, {pipeline_mode = #tpu.pipeline_mode<synchronous>, transform_indices = @transform_5, window_bounds = array<i64: 32, 48>}, {pipeline_mode = #tpu.pipeline_mode<synchronous>, transform_indices = @transform_6, window_bounds = array<i64: 1, 48>}, {pipeline_mode = #tpu.pipeline_mode<synchronous>, transform_indices = @transform_7, window_bounds = array<i64: 48, 7>}, {pipeline_mode = #tpu.pipeline_mode<synchronous>, transform_indices = @transform_8, window_bounds = array<i64: 1, 7>}, {transform_indices = @transform_9, window_bounds = array<i64: 16, 7>}]} {
    %c0 = arith.constant 0 : index
    %c0_0 = arith.constant 0 : index
    %0 = vector.load %arg1[%c0, %c0_0] : memref<16x384xf32, #tpu.memory_space<vmem>>, vector<16x384xf32>
    %1 = vector.extract_strided_slice %0 {offsets = [0, 0], sizes = [16, 32], strides = [1, 1]} : vector<16x384xf32> to vector<16x32xf32>
    %2 = vector.extract_strided_slice %0 {offsets = [0, 32], sizes = [16, 32], strides = [1, 1]} : vector<16x384xf32> to vector<16x32xf32>
    %3 = arith.maximumf %1, %2 : vector<16x32xf32>
    %4 = vector.extract_strided_slice %0 {offsets = [0, 64], sizes = [16, 32], strides = [1, 1]} : vector<16x384xf32> to vector<16x32xf32>
    %5 = vector.extract_strided_slice %0 {offsets = [0, 96], sizes = [16, 32], strides = [1, 1]} : vector<16x384xf32> to vector<16x32xf32>
    %6 = arith.maximumf %4, %5 : vector<16x32xf32>
    %7 = vector.extract_strided_slice %0 {offsets = [0, 128], sizes = [16, 32], strides = [1, 1]} : vector<16x384xf32> to vector<16x32xf32>
    %8 = arith.maximumf %6, %7 : vector<16x32xf32>
    %9 = vector.extract_strided_slice %0 {offsets = [0, 160], sizes = [16, 32], strides = [1, 1]} : vector<16x384xf32> to vector<16x32xf32>
    %10 = arith.maximumf %8, %9 : vector<16x32xf32>
    %11 = vector.extract_strided_slice %0 {offsets = [0, 192], sizes = [16, 32], strides = [1, 1]} : vector<16x384xf32> to vector<16x32xf32>
    %12 = arith.maximumf %10, %11 : vector<16x32xf32>
    %13 = vector.extract_strided_slice %0 {offsets = [0, 224], sizes = [16, 32], strides = [1, 1]} : vector<16x384xf32> to vector<16x32xf32>
    %14 = arith.maximumf %12, %13 : vector<16x32xf32>
    %15 = vector.extract_strided_slice %0 {offsets = [0, 256], sizes = [16, 32], strides = [1, 1]} : vector<16x384xf32> to vector<16x32xf32>
    %16 = arith.maximumf %14, %15 : vector<16x32xf32>
    %17 = vector.extract_strided_slice %0 {offsets = [0, 288], sizes = [16, 32], strides = [1, 1]} : vector<16x384xf32> to vector<16x32xf32>
    %18 = arith.maximumf %16, %17 : vector<16x32xf32>
    %19 = vector.extract_strided_slice %0 {offsets = [0, 320], sizes = [16, 32], strides = [1, 1]} : vector<16x384xf32> to vector<16x32xf32>
    %20 = vector.extract_strided_slice %0 {offsets = [0, 352], sizes = [16, 32], strides = [1, 1]} : vector<16x384xf32> to vector<16x32xf32>
    %21 = arith.maximumf %19, %20 : vector<16x32xf32>
    %c0_1 = arith.constant 0 : index
    %c0_2 = arith.constant 0 : index
    %22 = vector.load %arg3[%c0_1, %c0_2] : memref<32x32xf32, #tpu.memory_space<vmem>>, vector<32x32xf32>
    %cst = arith.constant dense<0.000000e+00> : vector<16x32xf32>
    %23 = tpu.matmul %18, %22, %cst {dimension_numbers = #tpu.dot_dimension_numbers<[1], [0], [0], [1], [0, 0, 1, 1], [], []>} : vector<16x32xf32>, vector<32x32xf32>, vector<16x32xf32> -> vector<16x32xf32>
    %c0_3 = arith.constant 0 : index
    %c0_4 = arith.constant 0 : index
    %24 = vector.load %arg2[%c0_3, %c0_4] : memref<32x32xf32, #tpu.memory_space<vmem>>, vector<32x32xf32>
    %cst_5 = arith.constant dense<0.000000e+00> : vector<16x32xf32>
    %25 = tpu.matmul %3, %24, %cst_5 {dimension_numbers = #tpu.dot_dimension_numbers<[1], [0], [0], [1], [0, 0, 1, 1], [], []>} : vector<16x32xf32>, vector<32x32xf32>, vector<16x32xf32> -> vector<16x32xf32>
    %26 = arith.subf %23, %25 : vector<16x32xf32>
    %c0_6 = arith.constant 0 : index
    %c0_7 = arith.constant 0 : index
    %27 = vector.load %arg4[%c0_6, %c0_7] : memref<32x32xf32, #tpu.memory_space<vmem>>, vector<32x32xf32>
    %cst_8 = arith.constant dense<0.000000e+00> : vector<16x32xf32>
    %28 = tpu.matmul %21, %27, %cst_8 {dimension_numbers = #tpu.dot_dimension_numbers<[1], [0], [0], [1], [0, 0, 1, 1], [], []>} : vector<16x32xf32>, vector<32x32xf32>, vector<16x32xf32> -> vector<16x32xf32>
    %29 = arith.subf %26, %28 : vector<16x32xf32>
    %c0_9 = arith.constant 0 : index
    %c0_10 = arith.constant 0 : index
    %30 = vector.load %arg5[%c0_9, %c0_10] : memref<1x32xf32, #tpu.memory_space<vmem>>, vector<1x32xf32>
    %31 = vector.broadcast %30 : vector<1x32xf32> to vector<16x32xf32>
    %32 = arith.addf %29, %31 : vector<16x32xf32>
    %cst_11 = arith.constant 0.000000e+00 : f32
    %33 = vector.broadcast %cst_11 : f32 to vector<16x32xf32>
    %34 = arith.maximumf %32, %33 : vector<16x32xf32>
    %c0_12 = arith.constant 0 : index
    %c0_13 = arith.constant 0 : index
    %35 = vector.load %arg6[%c0_12, %c0_13] : memref<32x48xf32, #tpu.memory_space<vmem>>, vector<32x48xf32>
    %cst_14 = arith.constant dense<0.000000e+00> : vector<16x48xf32>
    %36 = tpu.matmul %34, %35, %cst_14 {dimension_numbers = #tpu.dot_dimension_numbers<[1], [0], [0], [1], [0, 0, 1, 1], [], []>} : vector<16x32xf32>, vector<32x48xf32>, vector<16x48xf32> -> vector<16x48xf32>
    %c0_15 = arith.constant 0 : index
    %c0_16 = arith.constant 0 : index
    %37 = vector.load %arg7[%c0_15, %c0_16] : memref<1x48xf32, #tpu.memory_space<vmem>>, vector<1x48xf32>
    %38 = vector.broadcast %37 : vector<1x48xf32> to vector<16x48xf32>
    %39 = arith.addf %36, %38 : vector<16x48xf32>
    %cst_17 = arith.constant 0.000000e+00 : f32
    %40 = vector.broadcast %cst_17 : f32 to vector<16x48xf32>
    %41 = arith.maximumf %39, %40 : vector<16x48xf32>
    %c0_18 = arith.constant 0 : index
    %c0_19 = arith.constant 0 : index
    %42 = vector.load %arg8[%c0_18, %c0_19] : memref<48x7xf32, #tpu.memory_space<vmem>>, vector<48x7xf32>
    %cst_20 = arith.constant dense<0.000000e+00> : vector<16x7xf32>
    %43 = tpu.matmul %41, %42, %cst_20 {dimension_numbers = #tpu.dot_dimension_numbers<[1], [0], [0], [1], [0, 0, 1, 1], [], []>} : vector<16x48xf32>, vector<48x7xf32>, vector<16x7xf32> -> vector<16x7xf32>
    %c0_21 = arith.constant 0 : index
    %c0_22 = arith.constant 0 : index
    %44 = vector.load %arg9[%c0_21, %c0_22] : memref<1x7xf32, #tpu.memory_space<vmem>>, vector<1x7xf32>
    %45 = vector.broadcast %44 : vector<1x7xf32> to vector<16x7xf32>
    %46 = arith.addf %43, %45 : vector<16x7xf32>
    %c0_23 = arith.constant 0 : index
    %c0_24 = arith.constant 0 : index
    %47 = vector.load %arg10[%c0_23, %c0_24] : memref<16x7xf32, #tpu.memory_space<vmem>>, vector<16x7xf32>
    tpu.vector_store %arg10[%c0_23, %c0_24], %46 {strides = array<i32>} : memref<16x7xf32, #tpu.memory_space<vmem>>, vector<16x7xf32>,
    return
  }
  func.func @transform_0(%arg0: i32) -> (i32, i32) {
    %c0_i32 = arith.constant 0 : i32
    %c0_i32_0 = arith.constant 0 : i32
    return %arg0, %c0_i32 : i32, i32
  }
  func.func @transform_1(%arg0: i32) -> (i32, i32) {
    %c0_i32 = arith.constant 0 : i32
    %c0_i32_0 = arith.constant 0 : i32
    %c0_i32_1 = arith.constant 0 : i32
    return %c0_i32, %c0_i32_0 : i32, i32
  }
  func.func @transform_2(%arg0: i32) -> (i32, i32) {
    %c0_i32 = arith.constant 0 : i32
    %c0_i32_0 = arith.constant 0 : i32
    %c0_i32_1 = arith.constant 0 : i32
    return %c0_i32, %c0_i32_0 : i32, i32
  }
  func.func @transform_3(%arg0: i32) -> (i32, i32) {
    %c0_i32 = arith.constant 0 : i32
    %c0_i32_0 = arith.constant 0 : i32
    %c0_i32_1 = arith.constant 0 : i32
    return %c0_i32, %c0_i32_0 : i32, i32
  }
  func.func @transform_4(%arg0: i32) -> (i32, i32) {
    %c0_i32 = arith.constant 0 : i32
    %c0_i32_0 = arith.constant 0 : i32
    %c0_i32_1 = arith.constant 0 : i32
    return %c0_i32, %c0_i32_0 : i32, i32
  }
  func.func @transform_5(%arg0: i32) -> (i32, i32) {
    %c0_i32 = arith.constant 0 : i32
    %c0_i32_0 = arith.constant 0 : i32
    %c0_i32_1 = arith.constant 0 : i32
    return %c0_i32, %c0_i32_0 : i32, i32
  }
  func.func @transform_6(%arg0: i32) -> (i32, i32) {
    %c0_i32 = arith.constant 0 : i32
    %c0_i32_0 = arith.constant 0 : i32
    %c0_i32_1 = arith.constant 0 : i32
    return %c0_i32, %c0_i32_0 : i32, i32
  }
  func.func @transform_7(%arg0: i32) -> (i32, i32) {
    %c0_i32 = arith.constant 0 : i32
    %c0_i32_0 = arith.constant 0 : i32
    %c0_i32_1 = arith.constant 0 : i32
    return %c0_i32, %c0_i32_0 : i32, i32
  }
  func.func @transform_8(%arg0: i32) -> (i32, i32) {
    %c0_i32 = arith.constant 0 : i32
    %c0_i32_0 = arith.constant 0 : i32
    %c0_i32_1 = arith.constant 0 : i32
    return %c0_i32, %c0_i32_0 : i32, i32
  }
  func.func @transform_9(%arg0: i32) -> (i32, i32) {
    %c0_i32 = arith.constant 0 : i32
    %c0_i32_0 = arith.constant 0 : i32
    return %arg0, %c0_i32 : i32, i32
  }
}

</mosaic_0001>

<bundles_post_ra>
// kernel: tpu_custom_call.1
= control target key start
LH: loop header
LB: loop body
LE: loop exit
PB: predicated region body
PF: predicated region fallthrough
CT: control target
= control target key end

     0   :  { %14 = vsyncpa [#allocation3], 0  ;;  %s1006_s0 = inlined_call_operand.vmem [shape: f32[16,384], index: 0, kind: input, shape index: {}]   ;;  %s1007_s1 = inlined_call_operand.hbm [shape: f32[32,32], index: 1, kind: input, shape index: {}]   ;;  %s1008_s2 = inlined_call_operand.hbm [shape: f32[32,32], index: 2, kind: input, shape index: {}]   ;;  %s1009_s3 = inlined_call_operand.hbm [shape: f32[32,32], index: 3, kind: input, shape index: {}]   ;;  %s1010_s4 = inlined_call_operand.vmem [shape: f32[1,32], index: 4, kind: input, shape index: {}]   ;;  %s1011_s5 = inlined_call_operand.hbm [shape: f32[32,48], index: 5, kind: input, shape index: {}]   ;;  %s1012_s6 = inlined_call_operand.vmem [shape: f32[1,48], index: 6, kind: input, shape index: {}]   ;;  %s1013_s7 = inlined_call_operand.vmem [shape: f32[48,7], index: 7, kind: input, shape index: {}]   ;;  %s1014_s8 = inlined_call_operand.vmem [shape: f32[1,7], index: 8, kind: input, shape index: {}]   ;;  %s1015_s9 = inlined_call_operand.vmem [shape: f32[16,7], index: 9, kind: output, shape index: {}]  }
   0x1   :  { %15 = vsyncpa [#allocation5], 0 }
   0x2   :  { %16 = vsyncpa [#allocation8], 0  ;;  %s834_s30 = smov [#allocation4]   ;;  %s835_s11 = smov [#allocation2]  }
   0x3   :  { %s36_s10 = sshll.u32 %s834_s30, 4  ;;  %s24_s12 = sshll.u32 %s835_s11, 4  ;;  %s37_s10 = int_to_ptr.vmem [resolvable:$true] %s36_s10  ;;  %s25_s12 = int_to_ptr.vmem [resolvable:$true] %s24_s12 }
   0x4   :  { %s756_s13 = scalar_lea.vmem %s37_s10, 512  ;;  %p761_p1 = scmp.lt.s32.totalorder %s37_s10, %s37_s10 }
   0x5   :  { %p757_p0 = scmp.ne.s32.totalorder %s37_s10, %s756_s13  ;;  %p762_p2 = scmp.lt.s32.totalorder %s756_s13, %s756_s13 }
   0x7   :  { %p763_p3 = por %p762_p2, %p761_p1 }
   0x9   :  { %p764_p4 = pnand %p763_p3, %p757_p0 }
   0xb   :  { %767 = shalt.err (!%p764_p4)
}
   0xc   :  { %s836_s14 = smov 128   ;;  %s837_s15 = smov 8  }
   0xd   :  { %42 = dma.hbm_to_vmem [thread:$0]  %s1008_s2, 512, %s37_s10, [#allocation5], %s836_s14, %s836_s14, %s837_s15  }
   0xe   :  { %s776_s18 = scalar_lea.vmem %s25_s12, 512  ;;  %p781_p6 = scmp.lt.s32.totalorder %s25_s12, %s25_s12 }
   0xf   :  { %p777_p5 = scmp.ne.s32.totalorder %s25_s12, %s776_s18  ;;  %p782_p7 = scmp.lt.s32.totalorder %s776_s18, %s776_s18 }
  0x11   :  { %p783_p8 = por %p782_p7, %p781_p6 }
  0x13   :  { %p784_p9 = pnand %p783_p8, %p777_p5 }
  0x15   :  { %787 = shalt.err (!%p784_p9)
}
  0x16   :  { %30 = dma.hbm_to_vmem [thread:$0]  %s1007_s1, 512, %s25_s12, [#allocation3], %s836_s14, %s836_s14, %s837_s15  }
  0x17   :  { %s838_s21 = smov [#allocation6]   ;;  %s839_s23 = smov [#allocation7]  }
  0x18   :  { %s48_s22 = sshll.u32 %s838_s21, 4  ;;  %s62_s24 = sshll.u32 %s839_s23, 4  ;;  %s49_s22 = int_to_ptr.vmem [resolvable:$true] %s48_s22  ;;  %s63_s24 = int_to_ptr.vmem [resolvable:$true] %s62_s24 }
  0x19   :  { %s796_s2 = scalar_lea.vmem %s49_s22, 512  ;;  %p801_p11 = scmp.lt.s32.totalorder %s49_s22, %s49_s22 }
  0x1a   :  { %p797_p10 = scmp.ne.s32.totalorder %s49_s22, %s796_s2  ;;  %p802_p12 = scmp.lt.s32.totalorder %s796_s2, %s796_s2 }
  0x1c   :  { %p803_p13 = por %p802_p12, %p801_p11 }
  0x1e   :  { %p804_p0 = pnand %p803_p13, %p797_p10 }
  0x20   :  { %807 = shalt.err (!%p804_p0)
}
  0x21   :  { %54 = dma.hbm_to_vmem [thread:$0]  %s1009_s3, 512, %s49_s22, [#allocation5], %s836_s14, %s836_s14, %s837_s15  }
  0x22   :  { %s816_s1 = scalar_lea.vmem %s63_s24, 512  ;;  %p821_p2 = scmp.lt.s32.totalorder %s63_s24, %s63_s24 }
  0x23   :  { %p817_p1 = scmp.ne.s32.totalorder %s63_s24, %s816_s1  ;;  %p822_p3 = scmp.lt.s32.totalorder %s816_s1, %s816_s1 }
  0x25   :  { %p823_p4 = por %p822_p3, %p821_p2 }
  0x27   :  { %p824_p5 = pnand %p823_p4, %p817_p1 }
  0x29   :  { %827 = shalt.err (!%p824_p5)
}
  0x2a   :  { %68 = dma.hbm_to_vmem [thread:$0]  %s1011_s5, 512, %s63_s24, [#allocation8], %s836_s14, %s836_s14, %s837_s15  }
  0x2b   :  { %828 = dma.done.wait [#allocation3], 512  }
  0x2c   :  { %829 = vsyncadd [#allocation3], 4294966784 }
  0x2d   :  { %830 = dma.done.wait [#allocation5], 1024  }
  0x2e   :  { %831 = vsyncadd [#allocation5], 4294966272 }
  0x2f   :  { %832 = dma.done.wait [#allocation8], 512  }
  0x30   :  { %833 = vsyncadd [#allocation8], 4294966784  ;;  %v920_v0 = vld [vmem:[%s1006_s0 + $0x8] sm:$0xff]  ;;  %v87_v1 = vld [vmem:[%s1006_s0] sm:$0xff]  ;;  %s840_s11 = smov 64   ;;  %s841_s5 = smov 96  }
  0x31   :  { %105 = vrot.lane.b32.xlu1 %v920_v0, %s840_s11  ;;  %95 = vrot.lane.b32.xlu0 %v87_v1, %s841_s5  ;;  %v91_v2 = vld [vmem:[%s1006_s0 + $0x20] sm:$0xff]  ;;  %v90_v3 = vld [vmem:[%s1006_s0 + $0x18] sm:$0xff]  ;;  %s842_s16 = smov 32   ;;  %v159_v7 = vld [vmem:[#allocation4 + $0x10] sm:$0xff]  ;;  %vm167_vm0 = vcmask 261120   ;;  %vm543_vm1 = vcmask 392192  }
  0x32   :  { %v939_v4 = vld [vmem:[%s1006_s0 + $0x28] sm:$0xff]  ;;  %v944_v5 = vld [vmem:[%s1006_s0 + $0x10] sm:$0xff]  ;;  %v160_v6 = vld [vmem:[#allocation4 + $0x18] sm:$0xff]  ;;  %vm625_vm2 = vcmask 56320  }
  0x33   :  { %680 = vmatprep.subr.mxu1 %v160_v6  ;;  %v158_v8 = vld [vmem:[#allocation4 + $0x8] sm:$0xff]  ;;  %v157_v9 = vld [vmem:[#allocation4] sm:$0xff]  ;;  %v250_v22 = vld [vmem:[#allocation2 + $0x18] sm:$0xff] }
  0x34   :  { %681 = vmatpush3.msra.mxu1 %v160_v6  ;;  %v337_v23 = vld [vmem:[#allocation6 + $0x18] sm:$0xff]  ;;  %v336_v26 = vld [vmem:[#allocation6 + $0x10] sm:$0xff]  ;;  %v335_v29 = vld [vmem:[#allocation6 + $0x8] sm:$0xff] }
  0x35   :  { %107 = vrot.lane.b32.xlu1 %v91_v2, %s840_s11  ;;  %97 = vrot.lane.b32.xlu0 %v90_v3, %s841_s5  ;;  %v334_v32 = vld [vmem:[#allocation6] sm:$0xff]  ;;  %v249_v47 = vld [vmem:[#allocation2 + $0x10] sm:$0xff]  ;;  %v248_v48 = vld [vmem:[#allocation2 + $0x8] sm:$0xff] }
  0x36   :  { %682 = vmatprep.subr.mxu1 %v159_v7  ;;  %702 = vmatprep.subr.mxu0 %v337_v23  ;;  %v247_v51 = vld [vmem:[#allocation2] sm:$0xff]  ;;  %v439_v52 = vld [vmem:[#allocation7 + $0x18] sm:$0xff]  ;;  %v438_v53 = vld [vmem:[#allocation7 + $0x10] sm:$0xff] }
  0x37   :  { %683 = vmatpush3.msra.mxu1 %v159_v7  ;;  %703 = vmatpush3.msra.mxu0 %v337_v23  ;;  %v437_v54 = vld [vmem:[#allocation7 + $0x8] sm:$0xff]  ;;  %v436_v55 = vld [vmem:[#allocation7] sm:$0xff] }
  0x38   :  { %684 = vmatprep.subr.mxu1 %v158_v8  ;;  %704 = vmatprep.subr.mxu0 %v336_v26  ;;  %v535_v56 = vld [vmem:[%s1013_s7 + $0x28] sm:$0xff]  ;;  %v534_v57 = vld [vmem:[%s1013_s7 + $0x20] sm:$0xff] }
  0x39   :  { %115 = vrot.lane.b32.xlu1 %v91_v2, %s842_s16  ;;  %113 = vrot.lane.b32.xlu0 %v920_v0, %s842_s16 }
  0x3a   :  { %685 = vmatpush3.msra.mxu1 %v158_v8  ;;  %705 = vmatpush3.msra.mxu0 %v336_v26 }
  0x3b   :  { %686 = vmatprep.subr.mxu1 %v157_v9  ;;  %706 = vmatprep.subr.mxu0 %v335_v29 }
  0x3c   :  { %687 = vmatpush3.msra.mxu1 %v157_v9  ;;  %707 = vmatpush3.msra.mxu0 %v335_v29  ;;  %v533_v9 = vld [vmem:[%s1013_s7 + $0x18] sm:$0xff] }
  0x3d   :  { %125 = vrot.lane.b32.xlu1 %v91_v2, %s841_s5  ;;  %123 = vrot.lane.b32.xlu0 %v920_v0, %s841_s5 }
  0x3e   :  { %691 = vmatprep.subr.mxu1 %v250_v22  ;;  %708 = vmatprep.subr.mxu0 %v334_v32 }
  0x3f   :  { %709 = vmatpush3.msra.mxu0 %v334_v32 }
  0x40   :  { %724 = vmatprep.subr.mxu0 %v535_v56 }
  0x41   :  { %135 = vrot.lane.b32.xlu1 %v939_v4, %s840_s11  ;;  %133 = vrot.lane.b32.xlu0 %v944_v5, %s840_s11 }
  0x45   :  { %143 = vrot.lane.b32.xlu1 %v939_v4, %s842_s16  ;;  %141 = vrot.lane.b32.xlu0 %v944_v5, %s842_s16 }
  0x49   :  { %149 = vrot.lane.b32.xlu0 %v944_v5, %s841_s5  ;;  %151 = vrot.lane.b32.xlu1 %v939_v4, %s841_s5 }
  0xa3   :  { %v106_v10 = vpop.permute.xlu1 %105  ;;  %v96_v11 = vpop.permute.xlu0 %95 }
  0xa4   :  { %v101_v12 = vmax.f32 %v87_v1, %v96_v11  ;;  %v641_v1 = vld [vmem:[%s1010_s4] ss:$0 sm:$0xff]  ;;  %v531_v11 = vld [vmem:[%s1013_s7 + $0x8] sm:$0xff] }
  0xa6   :  { %v111_v17 = vmax.f32 %v101_v12, %v106_v10  ;;  %v532_v10 = vld [vmem:[%s1013_s7 + $0x10] sm:$0xff] }
  0xa7   :  { %v108_v13 = vpop.permute.xlu1 %107  ;;  %v98_v14 = vpop.permute.xlu0 %97 }
  0xa8   :  { %v954_v15 = vmax.f32 %v90_v3, %v98_v14 }
  0xaa   :  { %v112_v16 = vmax.f32 %v954_v15, %v108_v13  ;;  %v642_v13 = vld [vmem:[%s1012_s6] ss:$0 sm:$0xff] }
  0xab   :  { %v116_v18 = vpop.permute.xlu1 %115  ;;  %v114_v19 = vpop.permute.xlu0 %113 }
  0xac   :  { %v120_v20 = vmax.f32 %v112_v16, %v116_v18  ;;  %v119_v21 = vmax.f32 %v111_v17, %v114_v19 }
  0xae   :  { %v122_v27 = vmax.f32 %v120_v20, %v91_v2  ;;  %v121_v28 = vmax.f32 %v119_v21, %v920_v0  ;;  %v645_v20 = vld [vmem:[%s1014_s8] ss:$0 sm:$0xff] }
  0xaf   :  { %v126_v24 = vpop.permute.xlu1 %125  ;;  %v124_v25 = vpop.permute.xlu0 %123 }
  0xb0   :  { %v130_v33 = vmax.f32 %v122_v27, %v126_v24  ;;  %v129_v34 = vmax.f32 %v121_v28, %v124_v25 }
  0xb3   :  { %v136_v30 = vpop.permute.xlu1 %135  ;;  %v134_v31 = vpop.permute.xlu0 %133 }
  0xb4   :  { %v140_v35 = vmax.f32 %v130_v33, %v136_v30  ;;  %v139_v36 = vmax.f32 %v129_v34, %v134_v31 }
  0xb7   :  { %v144_v37 = vpop.permute.xlu1 %143  ;;  %v142_v38 = vpop.permute.xlu0 %141 }
  0xb8   :  { %v148_v39 = vmax.f32 %v140_v35, %v144_v37  ;;  %v147_v40 = vmax.f32 %v139_v36, %v142_v38 }
  0xba   :  { %165 = vrot.lane.b32.xlu1 %v148_v39, %s840_s11  ;;  %163 = vrot.lane.b32.xlu0 %v147_v40, %s840_s11 }
  0xbb   :  { %v150_v41 = vpop.permute.xlu0 %149  ;;  %v152_v42 = vpop.permute.xlu1 %151 }
  0xbc   :  { %v155_v43 = vmax.f32 %v944_v5, %v150_v41  ;;  %v156_v44 = vmax.f32 %v939_v4, %v152_v42 }
  0xbe   :  { %340 = vrot.lane.b32.xlu0 %v155_v43, %s840_s11  ;;  %342 = vrot.lane.b32.xlu1 %v156_v44, %s840_s11 }
 0x12c   :  { %v166_v45 = vpop.permute.xlu1 %165  ;;  %v164_v46 = vpop.permute.xlu0 %163 }
 0x12d   :  { %688 = vmatprep.mubr.msk.f32.mxu1 %vm167_vm0, %v164_v46 }
 0x12e   :  { %689 = vmatmul.mubr.msk.f32.vlgmr.msra.gmra.mxu1 %vm167_vm0, %v166_v45 }
 0x12f   :  { %692 = vmatpush3.msra.mxu1 %v250_v22  ;;  %699 = vmatprep.mubr.msk.f32.mxu1 %vm167_vm0, %v101_v12  ;;  %v530_v12 = vld [vmem:[%s1013_s7] sm:$0xff] }
 0x130   :  { %693 = vmatprep.subr.mxu1 %v249_v47  ;;  %v341_v49 = vpop.permute.xlu0 %340  ;;  %v343_v50 = vpop.permute.xlu1 %342 }
 0x131   :  { %694 = vmatpush3.msra.mxu1 %v249_v47  ;;  %710 = vmatprep.mubr.msk.f32.mxu0 %vm167_vm0, %v341_v49 }
 0x132   :  { %695 = vmatprep.subr.mxu1 %v248_v48  ;;  %711 = vmatmul.mubr.msk.f32.vlgmr.msra.gmra.mxu0 %vm167_vm0, %v343_v50 }
 0x133   :  { %696 = vmatpush3.msra.mxu1 %v248_v48  ;;  %725 = vmatpush3.msra.mxu0 %v535_v56 }
 0x134   :  { %697 = vmatprep.subr.mxu1 %v247_v51  ;;  %726 = vmatprep.subr.mxu0 %v534_v57 }
 0x135   :  { %698 = vmatpush3.msra.mxu1 %v247_v51  ;;  %727 = vmatpush3.msra.mxu0 %v534_v57 }
 0x136   :  { %700 = vmatmul.mubr.msk.f32.vlgmr.msra.gmra.mxu1 %vm167_vm0, %v954_v15  ;;  %713 = vmatprep.subr.mxu1 %v439_v52 }
 0x137   :  { %714 = vmatpush3.msra.mxu1 %v439_v52  ;;  %728 = vmatprep.subr.mxu0 %v533_v9 }
 0x138   :  { %715 = vmatprep.subr.mxu1 %v438_v53  ;;  %729 = vmatpush3.msra.mxu0 %v533_v9 }
 0x139   :  { %716 = vmatpush3.msra.mxu1 %v438_v53  ;;  %730 = vmatprep.subr.mxu0 %v532_v10 }
 0x13a   :  { %717 = vmatprep.subr.mxu1 %v437_v54  ;;  %731 = vmatpush3.msra.mxu0 %v532_v10 }
 0x13b   :  { %718 = vmatpush3.msra.mxu1 %v437_v54  ;;  %732 = vmatprep.subr.mxu0 %v531_v11 }
 0x13c   :  { %719 = vmatprep.subr.mxu1 %v436_v55  ;;  %733 = vmatpush3.msra.mxu0 %v531_v11 }
 0x13d   :  { %720 = vmatpush3.msra.mxu1 %v436_v55  ;;  %734 = vmatprep.subr.mxu0 %v530_v12 }
 0x13e   :  { %735 = vmatpush3.msra.mxu0 %v530_v12 }
 0x1ee   :  { %v690_v58 = vpop.f32.mrf.mxu1 }
 0x1f0   :  { %v238_v59 = vpop.f32.mrf.mxu1 }
 0x1f2   :  { %v712_v61 = vpop.f32.mrf.mxu0 }
 0x1f4   :  { %v414_v3 = vpop.f32.mrf.mxu0 }
 0x1f6   :  { %v701_v60 = vpop.f32.mrf.mxu1 }
 0x1f7   :  { %v333_v62 = vsub.f32 %v690_v58, %v701_v60 }
 0x1f8   :  { %v323_v63 = vpop.f32.mrf.mxu1 }
 0x1f9   :  { %v424_v0 = vsub.f32 %v333_v62, %v712_v61  ;;  %v332_v2 = vsub.f32 %v238_v59, %v323_v63 }
 0x1fb   :  { %v423_v4 = vsub.f32 %v332_v2, %v414_v3  ;;  %v433_v5 = vadd.f32 %v641_v1, %v424_v0 }
 0x1fd   :  { %v432_v6 = vadd.f32 %v641_v1, %v423_v4  ;;  %v435_v8 = vmax.f32 %v433_v5, 0.0 }
 0x1ff   :  { %v434_v7 = vmax.f32 %v432_v6, 0.0 }
 0x201   :  { %721 = vmatprep.mubr.msk.f32.mxu1 %vm167_vm0, %v434_v7 }
 0x202   :  { %722 = vmatmul.mubr.msk.f32.vlgmr.msra.gmra.mxu1 %vm167_vm0, %v435_v8 }
 0x2c2   :  { %v723_v14 = vpop.f32.mrf.mxu1 }
 0x2c3   :  { %v525_v15 = vadd.f32 %v723_v14, %v642_v13 }
 0x2c4   :  { %v519_v16 = vpop.f32.mrf.mxu1 }
 0x2c5   :  { %v520_v17 = vadd.f32 %v642_v13, %v519_v16  ;;  %v529_v19 = vmax.f32 %v525_v15, 0.0 }
 0x2c7   :  { %v528_v18 = vmax.f32 %v520_v17, 0.0 }
 0x2c9   :  { %736 = vmatprep.mubr.msk.f32.mxu0 %vm543_vm1, %v528_v18 }
 0x2ca   :  { %737 = vmatmul.mubr.msk.f32.vlgmr.msra.gmra.mxu0 %vm543_vm1, %v529_v19 }
 0x38a   :  { %v738_v21 = vpop.f32.mrf.mxu0 }
 0x38b   :  { %v622_v22 = vadd.f32 %v738_v21, %v645_v20 }
 0x38c   :  { %v616_v23 = vpop.f32.mrf.mxu0 }
 0x38d   :  { %627 = vst.msk [vmem:[%s1015_s9 + $0x8] sm:$0xff] %vm625_vm2, %v622_v22  ;;  %v617_v24 = vadd.f32 %v645_v20, %v616_v23 }
 0x38f   :  { %626 = vst.msk [vmem:[%s1015_s9] sm:$0xff] %vm625_vm2, %v617_v24 }
 0x390   :  { %632 = vsyncpa [#allocation3], 1 }
 0x391   :  { %633 = vsyncpa [#allocation5], 1 }
 0x392   :  { %634 = vsyncpa [#allocation8], 1 }

</bundles_post_ra>
